<compile_context>
chip_gen: v7x
topology: tpu7x:2x2x1
jax: 0.10.0
libtpu: 0.0.40
codegen_flags: <defaults>
</compile_context>

<pallas_src>
import functools

import jax
import jax.numpy as jnp
from jax.experimental import pallas as pl
from jax.experimental.pallas import tpu as pltpu

_PAD = 128  # aligned zero-extension width along the flat spatial axis (>= W + 1)


def _resblock_kernel(x_ref, w1_ref, b1_ref, w2_ref, b2_ref, mask_ref, out_ref,
                     *, C, H, W):
    """One batch element: out = x + conv2(relu(conv1(relu(x)))), all in VMEM."""
    L = H * W
    x = x_ref[0].astype(jnp.float32)        # (C, L)  -- spatial in lanes
    masks = mask_ref[...]                   # (2, L)  {0,1} f32
    mask_l = masks[0:1, :]                  # zeroes dx=-1 taps at column x == 0
    mask_r = masks[1:2, :]                  # zeroes dx=+1 taps at column x == W-1
    zpad = jnp.zeros((C, _PAD), jnp.float32)

    def conv3x3(a, w2d, b):
        # a: (C, L) f32, already ReLU'd.  SAME 3x3 conv as a single K=9C matmul.
        ext = jnp.concatenate([zpad, a, zpad], axis=1)       # (C, L + 2*_PAD)
        pieces = []
        for dy in range(3):
            for dx in range(3):
                start = _PAD + (dy - 1) * W + (dx - 1)
                p = ext[:, start:start + L]                  # shifted tap window
                if dx == 0:
                    p = p * mask_l
                elif dx == 2:
                    p = p * mask_r
                pieces.append(p)
        patch = jnp.concatenate(pieces, axis=0)              # (9C, L) im2col
        return jnp.dot(w2d, patch, preferred_element_type=jnp.float32) + b

    w1 = w1_ref[...].astype(jnp.float32)
    b1 = b1_ref[...].astype(jnp.float32)
    w2 = w2_ref[...].astype(jnp.float32)
    b2 = b2_ref[...].astype(jnp.float32)

    r = conv3x3(jnp.maximum(x, 0.0), w1, b1)    # conv1(relu(x)) -- stays on chip
    y = conv3x3(jnp.maximum(r, 0.0), w2, b2)    # conv2(relu(r))
    out_ref[0] = (x + y).astype(out_ref.dtype)  # residual add, lane-dense store


def res_block(x_nchw, w1_oihw, b1, w2_oihw, b2):
    """ResBlock forward (indim == outdim, stride == 1 => no downsample)."""
    N, C, H, W = x_nchw.shape
    L = H * W
    assert w1_oihw.shape == (C, C, 3, 3) and w2_oihw.shape == (C, C, 3, 3)
    assert _PAD >= W + 1

    # Lane-dense spatial layout (free reshape of contiguous NCHW).
    x = x_nchw.reshape(N, C, L)
    # OIHW -> (Cout, 9*Cin) with K ordered (dy*3+dx)*Cin + ci, matching the
    # order the kernel concatenates tap windows.
    w1 = jnp.transpose(w1_oihw, (0, 2, 3, 1)).reshape(C, 9 * C)
    w2 = jnp.transpose(w2_oihw, (0, 2, 3, 1)).reshape(C, 9 * C)
    b1c = b1.reshape(C, 1)
    b2c = b2.reshape(C, 1)

    # {0,1} masks along the flattened spatial axis for the left/right filter
    # columns (replaces explicit zero padding along W).
    col = jnp.arange(L, dtype=jnp.int32) % W
    masks = jnp.stack([col != 0, col != W - 1]).astype(jnp.float32)  # (2, L)

    kernel = functools.partial(_resblock_kernel, C=C, H=H, W=W)

    flops = N * 2 * (2 * 9 * C * C * L)                       # two 3x3 convs
    bytes_accessed = (2 * N * C * L + 2 * (9 * C * C + C) + 2 * L) * 4
    cost = pl.CostEstimate(flops=flops, transcendentals=0,
                           bytes_accessed=bytes_accessed)

    out = pl.pallas_call(
        kernel,
        out_shape=jax.ShapeDtypeStruct((N, C, L), x_nchw.dtype),
        grid=(N,),
        in_specs=[
            pl.BlockSpec((1, C, L), lambda n: (n, 0, 0)),     # x (per batch)
            pl.BlockSpec((C, 9 * C), lambda n: (0, 0)),       # w1
            pl.BlockSpec((C, 1), lambda n: (0, 0)),           # b1
            pl.BlockSpec((C, 9 * C), lambda n: (0, 0)),       # w2
            pl.BlockSpec((C, 1), lambda n: (0, 0)),           # b2
            pl.BlockSpec((2, L), lambda n: (0, 0)),           # edge masks
        ],
        out_specs=pl.BlockSpec((1, C, L), lambda n: (n, 0, 0)),
        compiler_params=pltpu.CompilerParams(
            dimension_semantics=("parallel",)),
        cost_estimate=cost,
    )(x, w1, b1c, w2, b2c, masks)
    return out.reshape(N, C, H, W)


# ------------------------------ reference ---------------------------------
def _conv_ref(x, w_oihw, b):
    y = jax.lax.conv_general_dilated(
        x, w_oihw, window_strides=(1, 1), padding=((1, 1), (1, 1)),
        dimension_numbers=("NCHW", "OIHW", "NCHW"))
    return y + b.reshape(1, -1, 1, 1)


def res_block_ref(x, w1_oihw, b1, w2_oihw, b2):
    r = _conv_ref(jnp.maximum(x, 0.0), w1_oihw, b1)
    r = _conv_ref(jnp.maximum(r, 0.0), w2_oihw, b2)
    return x + r


if __name__ == "__main__":
    N, C, H, W = 2, 4, 16, 16
    key = jax.random.PRNGKey(0)
    k1, k2, k3, k4, k5 = jax.random.split(key, 5)

    # "PyTorch-shaped" parameters: Conv2d weight (Cout, Cin, 3, 3), init
    # roughly like nn.Conv2d default (uniform in +/- 1/sqrt(fan_in)).
    fan_in = C * 3 * 3
    bound = 1.0 / (fan_in ** 0.5)
    x = jax.random.normal(k1, (N, C, H, W), jnp.float32)
    w1 = jax.random.uniform(k2, (C, C, 3, 3), jnp.float32, -bound, bound)
    b1 = jax.random.uniform(k3, (C,), jnp.float32, -bound, bound)
    w2 = jax.random.uniform(k4, (C, C, 3, 3), jnp.float32, -bound, bound)
    b2 = jax.random.uniform(k5, (C,), jnp.float32, -bound, bound)

    res_block_jit = jax.jit(res_block)
    out = jax.block_until_ready(res_block_jit(x, w1, b1, w2, b2))

    ref = res_block_ref(x, w1, b1, w2, b2)
    assert out.shape == (N, C, H, W)
    assert jnp.allclose(out, ref, atol=1e-4, rtol=1e-4), "mismatch vs reference"

    print("KERNEL_OK")
</pallas_src>

<mosaic_0001>
module attributes {stable_mosaic.version = 11 : i64} {
  func.func @_resblock_kernel(%arg0: i32, %arg1: memref<1x4x256xf32, #tpu.memory_space<vmem>>, %arg2: memref<4x36xf32, #tpu.memory_space<vmem>>, %arg3: memref<4x1xf32, #tpu.memory_space<vmem>>, %arg4: memref<4x36xf32, #tpu.memory_space<vmem>>, %arg5: memref<4x1xf32, #tpu.memory_space<vmem>>, %arg6: memref<2x256xf32, #tpu.memory_space<vmem>>, %arg7: memref<1x4x256xf32, #tpu.memory_space<vmem>>) attributes {dimension_semantics = [#tpu.dimension_semantics<parallel>], iteration_bounds = array<i64: 2>, scalar_prefetch = 0 : i64, scratch_operands = 0 : i64, tpu.core_type = #tpu.core_type<tc>, window_params = [{transform_indices = @transform_0, window_bounds = array<i64: 1, 4, 256>}, {pipeline_mode = #tpu.pipeline_mode<synchronous>, transform_indices = @transform_1, window_bounds = array<i64: 4, 36>}, {pipeline_mode = #tpu.pipeline_mode<synchronous>, transform_indices = @transform_2, window_bounds = array<i64: 4, 1>}, {pipeline_mode = #tpu.pipeline_mode<synchronous>, transform_indices = @transform_3, window_bounds = array<i64: 4, 36>}, {pipeline_mode = #tpu.pipeline_mode<synchronous>, transform_indices = @transform_4, window_bounds = array<i64: 4, 1>}, {pipeline_mode = #tpu.pipeline_mode<synchronous>, transform_indices = @transform_5, window_bounds = array<i64: 2, 256>}, {transform_indices = @transform_6, window_bounds = array<i64: 1, 4, 256>}]} {
    %c0 = arith.constant 0 : index
    %c0_0 = arith.constant 0 : index
    %c0_1 = arith.constant 0 : index
    %0 = vector.load %arg1[%c0, %c0_0, %c0_1] : memref<1x4x256xf32, #tpu.memory_space<vmem>>, vector<1x4x256xf32>
    %1 = vector.shape_cast %0 : vector<1x4x256xf32> to vector<4x256xf32>
    %c0_2 = arith.constant 0 : index
    %c0_3 = arith.constant 0 : index
    %2 = vector.load %arg6[%c0_2, %c0_3] : memref<2x256xf32, #tpu.memory_space<vmem>>, vector<2x256xf32>
    %3 = vector.extract_strided_slice %2 {offsets = [0, 0], sizes = [1, 256], strides = [1, 1]} : vector<2x256xf32> to vector<1x256xf32>
    %4 = vector.extract_strided_slice %2 {offsets = [1, 0], sizes = [1, 256], strides = [1, 1]} : vector<2x256xf32> to vector<1x256xf32>
    %cst = arith.constant 0.000000e+00 : f32
    %5 = vector.broadcast %cst : f32 to vector<4x128xf32>
    %c0_4 = arith.constant 0 : index
    %c0_5 = arith.constant 0 : index
    %6 = vector.load %arg2[%c0_4, %c0_5] : memref<4x36xf32, #tpu.memory_space<vmem>>, vector<4x36xf32>
    %c0_6 = arith.constant 0 : index
    %c0_7 = arith.constant 0 : index
    %7 = vector.load %arg3[%c0_6, %c0_7] : memref<4x1xf32, #tpu.memory_space<vmem>>, vector<4x1xf32>
    %c0_8 = arith.constant 0 : index
    %c0_9 = arith.constant 0 : index
    %8 = vector.load %arg4[%c0_8, %c0_9] : memref<4x36xf32, #tpu.memory_space<vmem>>, vector<4x36xf32>
    %c0_10 = arith.constant 0 : index
    %c0_11 = arith.constant 0 : index
    %9 = vector.load %arg5[%c0_10, %c0_11] : memref<4x1xf32, #tpu.memory_space<vmem>>, vector<4x1xf32>
    %cst_12 = arith.constant 0.000000e+00 : f32
    %10 = vector.broadcast %cst_12 : f32 to vector<4x256xf32>
    %11 = arith.maximumf %1, %10 : vector<4x256xf32>
    %12 = tpu.concatenate %5, %11, %5 in 1 : vector<4x128xf32>, vector<4x256xf32>, vector<4x128xf32> -> vector<4x512xf32>
    %13 = vector.extract_strided_slice %12 {offsets = [0, 111], sizes = [4, 256], strides = [1, 1]} : vector<4x512xf32> to vector<4x256xf32>
    %14 = vector.broadcast %3 : vector<1x256xf32> to vector<4x256xf32>
    %15 = arith.mulf %13, %14 : vector<4x256xf32>
    %16 = vector.extract_strided_slice %12 {offsets = [0, 112], sizes = [4, 256], strides = [1, 1]} : vector<4x512xf32> to vector<4x256xf32>
    %17 = vector.extract_strided_slice %12 {offsets = [0, 113], sizes = [4, 256], strides = [1, 1]} : vector<4x512xf32> to vector<4x256xf32>
    %18 = vector.broadcast %4 : vector<1x256xf32> to vector<4x256xf32>
    %19 = arith.mulf %17, %18 : vector<4x256xf32>
    %20 = vector.extract_strided_slice %12 {offsets = [0, 127], sizes = [4, 256], strides = [1, 1]} : vector<4x512xf32> to vector<4x256xf32>
    %21 = vector.broadcast %3 : vector<1x256xf32> to vector<4x256xf32>
    %22 = arith.mulf %20, %21 : vector<4x256xf32>
    %23 = vector.extract_strided_slice %12 {offsets = [0, 128], sizes = [4, 256], strides = [1, 1]} : vector<4x512xf32> to vector<4x256xf32>
    %24 = vector.extract_strided_slice %12 {offsets = [0, 129], sizes = [4, 256], strides = [1, 1]} : vector<4x512xf32> to vector<4x256xf32>
    %25 = vector.broadcast %4 : vector<1x256xf32> to vector<4x256xf32>
    %26 = arith.mulf %24, %25 : vector<4x256xf32>
    %27 = vector.extract_strided_slice %12 {offsets = [0, 143], sizes = [4, 256], strides = [1, 1]} : vector<4x512xf32> to vector<4x256xf32>
    %28 = vector.broadcast %3 : vector<1x256xf32> to vector<4x256xf32>
    %29 = arith.mulf %27, %28 : vector<4x256xf32>
    %30 = vector.extract_strided_slice %12 {offsets = [0, 144], sizes = [4, 256], strides = [1, 1]} : vector<4x512xf32> to vector<4x256xf32>
    %31 = vector.extract_strided_slice %12 {offsets = [0, 145], sizes = [4, 256], strides = [1, 1]} : vector<4x512xf32> to vector<4x256xf32>
    %32 = vector.broadcast %4 : vector<1x256xf32> to vector<4x256xf32>
    %33 = arith.mulf %31, %32 : vector<4x256xf32>
    %34 = tpu.concatenate %15, %16, %19, %22, %23, %26, %29, %30, %33 in 0 : vector<4x256xf32>, vector<4x256xf32>, vector<4x256xf32>, vector<4x256xf32>, vector<4x256xf32>, vector<4x256xf32>, vector<4x256xf32>, vector<4x256xf32>, vector<4x256xf32> -> vector<36x256xf32>
    %cst_13 = arith.constant dense<0.000000e+00> : vector<4x256xf32>
    %35 = tpu.matmul %6, %34, %cst_13 {dimension_numbers = #tpu.dot_dimension_numbers<[1], [0], [0], [1], [0, 0, 1, 1], [], []>} : vector<4x36xf32>, vector<36x256xf32>, vector<4x256xf32> -> vector<4x256xf32>
    %36 = vector.broadcast %7 : vector<4x1xf32> to vector<4x256xf32>
    %37 = arith.addf %35, %36 : vector<4x256xf32>
    %cst_14 = arith.constant 0.000000e+00 : f32
    %38 = vector.broadcast %cst_14 : f32 to vector<4x256xf32>
    %39 = arith.maximumf %37, %38 : vector<4x256xf32>
    %40 = tpu.concatenate %5, %39, %5 in 1 : vector<4x128xf32>, vector<4x256xf32>, vector<4x128xf32> -> vector<4x512xf32>
    %41 = vector.extract_strided_slice %40 {offsets = [0, 111], sizes = [4, 256], strides = [1, 1]} : vector<4x512xf32> to vector<4x256xf32>
    %42 = vector.broadcast %3 : vector<1x256xf32> to vector<4x256xf32>
    %43 = arith.mulf %41, %42 : vector<4x256xf32>
    %44 = vector.extract_strided_slice %40 {offsets = [0, 112], sizes = [4, 256], strides = [1, 1]} : vector<4x512xf32> to vector<4x256xf32>
    %45 = vector.extract_strided_slice %40 {offsets = [0, 113], sizes = [4, 256], strides = [1, 1]} : vector<4x512xf32> to vector<4x256xf32>
    %46 = vector.broadcast %4 : vector<1x256xf32> to vector<4x256xf32>
    %47 = arith.mulf %45, %46 : vector<4x256xf32>
    %48 = vector.extract_strided_slice %40 {offsets = [0, 127], sizes = [4, 256], strides = [1, 1]} : vector<4x512xf32> to vector<4x256xf32>
    %49 = vector.broadcast %3 : vector<1x256xf32> to vector<4x256xf32>
    %50 = arith.mulf %48, %49 : vector<4x256xf32>
    %51 = vector.extract_strided_slice %40 {offsets = [0, 128], sizes = [4, 256], strides = [1, 1]} : vector<4x512xf32> to vector<4x256xf32>
    %52 = vector.extract_strided_slice %40 {offsets = [0, 129], sizes = [4, 256], strides = [1, 1]} : vector<4x512xf32> to vector<4x256xf32>
    %53 = vector.broadcast %4 : vector<1x256xf32> to vector<4x256xf32>
    %54 = arith.mulf %52, %53 : vector<4x256xf32>
    %55 = vector.extract_strided_slice %40 {offsets = [0, 143], sizes = [4, 256], strides = [1, 1]} : vector<4x512xf32> to vector<4x256xf32>
    %56 = vector.broadcast %3 : vector<1x256xf32> to vector<4x256xf32>
    %57 = arith.mulf %55, %56 : vector<4x256xf32>
    %58 = vector.extract_strided_slice %40 {offsets = [0, 144], sizes = [4, 256], strides = [1, 1]} : vector<4x512xf32> to vector<4x256xf32>
    %59 = vector.extract_strided_slice %40 {offsets = [0, 145], sizes = [4, 256], strides = [1, 1]} : vector<4x512xf32> to vector<4x256xf32>
    %60 = vector.broadcast %4 : vector<1x256xf32> to vector<4x256xf32>
    %61 = arith.mulf %59, %60 : vector<4x256xf32>
    %62 = tpu.concatenate %43, %44, %47, %50, %51, %54, %57, %58, %61 in 0 : vector<4x256xf32>, vector<4x256xf32>, vector<4x256xf32>, vector<4x256xf32>, vector<4x256xf32>, vector<4x256xf32>, vector<4x256xf32>, vector<4x256xf32>, vector<4x256xf32> -> vector<36x256xf32>
    %cst_15 = arith.constant dense<0.000000e+00> : vector<4x256xf32>
    %63 = tpu.matmul %8, %62, %cst_15 {dimension_numbers = #tpu.dot_dimension_numbers<[1], [0], [0], [1], [0, 0, 1, 1], [], []>} : vector<4x36xf32>, vector<36x256xf32>, vector<4x256xf32> -> vector<4x256xf32>
    %64 = vector.broadcast %9 : vector<4x1xf32> to vector<4x256xf32>
    %65 = arith.addf %63, %64 : vector<4x256xf32>
    %66 = arith.addf %1, %65 : vector<4x256xf32>
    %c0_16 = arith.constant 0 : index
    %c0_17 = arith.constant 0 : index
    %c0_18 = arith.constant 0 : index
    %67 = vector.load %arg7[%c0_16, %c0_17, %c0_18] : memref<1x4x256xf32, #tpu.memory_space<vmem>>, vector<1x4x256xf32>
    %68 = vector.shape_cast %67 : vector<1x4x256xf32> to vector<4x256xf32>
    %69 = vector.shape_cast %66 : vector<4x256xf32> to vector<1x4x256xf32>
    tpu.vector_store %arg7[%c0_16, %c0_17, %c0_18], %69 {strides = array<i32>} : memref<1x4x256xf32, #tpu.memory_space<vmem>>, vector<1x4x256xf32>,
    return
  }
  func.func @transform_0(%arg0: i32) -> (i32, i32, i32) {
    %c0_i32 = arith.constant 0 : i32
    %c0_i32_0 = arith.constant 0 : i32
    %c0_i32_1 = arith.constant 0 : i32
    return %arg0, %c0_i32, %c0_i32_0 : i32, i32, i32
  }
  func.func @transform_1(%arg0: i32) -> (i32, i32) {
    %c0_i32 = arith.constant 0 : i32
    %c0_i32_0 = arith.constant 0 : i32
    %c0_i32_1 = arith.constant 0 : i32
    return %c0_i32, %c0_i32_0 : i32, i32
  }
  func.func @transform_2(%arg0: i32) -> (i32, i32) {
    %c0_i32 = arith.constant 0 : i32
    %c0_i32_0 = arith.constant 0 : i32
    %c0_i32_1 = arith.constant 0 : i32
    return %c0_i32, %c0_i32_0 : i32, i32
  }
  func.func @transform_3(%arg0: i32) -> (i32, i32) {
    %c0_i32 = arith.constant 0 : i32
    %c0_i32_0 = arith.constant 0 : i32
    %c0_i32_1 = arith.constant 0 : i32
    return %c0_i32, %c0_i32_0 : i32, i32
  }
  func.func @transform_4(%arg0: i32) -> (i32, i32) {
    %c0_i32 = arith.constant 0 : i32
    %c0_i32_0 = arith.constant 0 : i32
    %c0_i32_1 = arith.constant 0 : i32
    return %c0_i32, %c0_i32_0 : i32, i32
  }
  func.func @transform_5(%arg0: i32) -> (i32, i32) {
    %c0_i32 = arith.constant 0 : i32
    %c0_i32_0 = arith.constant 0 : i32
    %c0_i32_1 = arith.constant 0 : i32
    return %c0_i32, %c0_i32_0 : i32, i32
  }
  func.func @transform_6(%arg0: i32) -> (i32, i32, i32) {
    %c0_i32 = arith.constant 0 : i32
    %c0_i32_0 = arith.constant 0 : i32
    %c0_i32_1 = arith.constant 0 : i32
    return %arg0, %c0_i32, %c0_i32_0 : i32, i32, i32
  }
}

</mosaic_0001>

<bundles_post_ra>
// kernel: res_block.1
= control target key start
LH: loop header
LB: loop body
LE: loop exit
PB: predicated region body
PF: predicated region fallthrough
CT: control target
= control target key end

     0   :  { %s1207_s21 = smov 0   ;;  %s1494_s0 = inlined_call_operand.vmem [shape: f32[2,4,256], index: 0, kind: input, shape index: {}]   ;;  %s1495_s1 = inlined_call_operand.vmem [shape: f32[4,36], index: 1, kind: input, shape index: {}]   ;;  %s1496_s2 = inlined_call_operand.vmem [shape: f32[4,1], index: 2, kind: input, shape index: {}]   ;;  %s1497_s3 = inlined_call_operand.vmem [shape: f32[4,36], index: 3, kind: input, shape index: {}]   ;;  %s1498_s4 = inlined_call_operand.vmem [shape: f32[4,1], index: 4, kind: input, shape index: {}]   ;;  %s1499_s5 = inlined_call_operand.vmem [shape: f32[2,256], index: 5, kind: input, shape index: {}]   ;;  %s1500_s6 = inlined_call_operand.vmem [shape: f32[2,4,256], index: 6, kind: output, shape index: {}]  }
   0x1 LB: > { %s961_s22 = sadd.s32 4294967295, %s1156_s21   ;;  %p965_p0 = scmp.ge.s32.totalorder %s1156_s21, 1  ;;  %s1156_s21 = sphi %s1207_s21, %s16_s21  }
   0x2   : > { %p212_p1 = scmp.lt.s32.totalorder %s1156_s21, 3 }
   0x4   : > { %p213_p2 = pnand %p965_p0, %p212_p1 }
   0x5   : > { %v263_v0 = vlaneseq (!%p213_p2)  ;;  %v1158_v1 = vmov (!%p213_p2), 0.0   ;;  %v253_v3 = vld [vmem:[%s1499_s5] sm:$0xf] (!%p213_p2)  ;;  %p242_p3 = scmp.lt.s32.totalorder (!%p213_p2), %s961_s22, 1  ;;  %s1159_s25 = smov (!%p213_p2), 113   ;;  %vm319_vm0 = vcmask (!%p213_p2), 924672  }
   0x6   : > { %216 = sbr.rel (%p213_p2) target bundleno = 1106 (0x452), region = 44  ;;  %638 = vmatprep.mubr.f32.mxu0 (!%p213_p2), %v1158_v1  ;;  %893 = vmatprep.mubr.f32.mxu1 (!%p213_p2), %v1158_v1  ;;  %s1160_s26 = smov (!%p213_p2), 127   ;;  %v1243_v21 = vrot.slane (!%p213_p2), %v1158_v1, 4  ;;  %vm331_vm1 = vcmask (!%p213_p2), 1039360   ;;  %vm343_vm2 = vcmask (!%p213_p2), 7168   ;;  %vm355_vm3 = vcmask (!%p213_p2), 121856  }
   0x7   : > { %v264_v2 = vshrl.u32 (!%p213_p2), %v263_v0, 7  ;;  %s1161_s7 = smov (!%p213_p2), 1   ;;  %s1162_s8 = smov (!%p213_p2), 15   ;;  %vm287_vm4 = vcmask (!%p213_p2), 908288   ;;  %vm367_vm5 = vcmask (!%p213_p2), 138240   ;;  %vm488_vm6 = vcmask (!%p213_p2), 1043456  }
   0x8   : > { %s1163_s9 = smov (!%p213_p2), 17   ;;  %s1164_s10 = smov (!%p213_p2), 111   ;;  %vm399_vm7 = vcmask (!%p213_p2), 1031168   ;;  %vm470_vm8 = vcmask (!%p213_p2), 777216   ;;  %vm458_vm9 = vcmask (!%p213_p2), 785408   ;;  %vm417_vm10 = vcmask (!%p213_p2), 916480  }
   0x9   : > { %v297_v4 = vsub.s32 (!%p213_p2), 1, %v264_v2  ;;  %v265_v5 = vsub.s32 (!%p213_p2), 0, %v264_v2  ;;  %v301_v6 = vsub.s32 (!%p213_p2), 3, %v264_v2  ;;  %v269_v7 = vsub.s32 (!%p213_p2), 2, %v264_v2  ;;  %s1165_s11 = smov (!%p213_p2), 95   ;;  %s1166_s12 = smov (!%p213_p2), 126  }
   0xa   : > { %s1167_s13 = smov (!%p213_p2), 96   ;;  %s1168_s14 = smov (!%p213_p2), 110   ;;  %vm443_vm11 = vcmask (!%p213_p2), 900096   ;;  %vm485_vm12 = vcmask (!%p213_p2), 769024   ;;  %vm566_vm13 = vcmask (!%p213_p2), 293888  }
   0xb   : > { %v298_v8 = vrot.slane (!%p213_p2), %v253_v3, %v297_v4  ;;  %v266_v9 = vrot.slane (!%p213_p2), %v253_v3, %v265_v5  ;;  %v302_v10 = vrot.slane (!%p213_p2), %v253_v3, %v301_v6  ;;  %v270_v11 = vrot.slane (!%p213_p2), %v253_v3, %v269_v7  ;;  %s1169_s15 = smov (!%p213_p2), 112   ;;  %s1170_s16 = smov (!%p213_p2), 94  }
   0xd   : > { %v308_v12 = vrot.slane %v298_v8, %v297_v4  ;;  %v276_v13 = vrot.slane %v266_v9, %v265_v5  ;;  %s1502_s22 = smov (!%p242_p3, %s961_s22), 1  ;;  %v312_v14 = vrot.slane %v302_v10, %v297_v4  ;;  %v280_v15 = vrot.slane %v270_v11, %v265_v5 }
   0xe   : > { %s978_s27 = sshll.u32 %s1502_s22, 3 }
   0xf   : > { %315 = vrot.lane.b32.xlu1 %v308_v12, %s1159_s25  ;;  %327 = vrot.lane.b32.xlu0 %v276_v13, %s1160_s26  ;;  %s246_s30 = scalar_lea.vmem %s1494_s0, %s978_s27 }
  0x10   : > { %v1228_v16 = vld [vmem:[%s246_s30] sm:$0xff]  ;;  %s251_s30 = scalar_lea.vmem %s1500_s6, %s978_s27 }
  0x11   : > { %v1231_v17 = vmax.f32 %v1228_v16, 0.0 }
  0x13   : > { %317 = vrot.lane.b32.xlu1 %v312_v14, %s1159_s25  ;;  %329 = vrot.lane.b32.xlu0 %v280_v15, %s1160_s26  ;;  %v1237_v18 = vcombine.high %v1231_v17, %v1231_v17  ;;  %v377_v19 = vrot.slane %v1231_v17, 4 }
  0x15   : > { %v1018_v20 = vpack.i.bf16 %v1237_v18, %v377_v19  ;;  %v1023_v22 = vpack.i.bf16 %v1237_v18, %v1231_v17 }
  0x17   : > { %341 = vrot.lane.b32.xlu1 %v312_v14, %s1161_s7  ;;  %339 = vrot.lane.b32.xlu0 %v308_v12, %s1161_s7 }
  0x1b   : > { %353 = vrot.lane.b32.xlu1 %v280_v15, %s1162_s8  ;;  %351 = vrot.lane.b32.xlu0 %v276_v13, %s1162_s8 }
  0x1f   : > { %365 = vrot.lane.b32.xlu1 %v312_v14, %s1163_s9  ;;  %363 = vrot.lane.b32.xlu0 %v308_v12, %s1163_s9 }
  0x23   : > { %283 = vrot.lane.b32.xlu0 %v276_v13, %s1164_s10  ;;  %285 = vrot.lane.b32.xlu1 %v280_v15, %s1164_s10 }
  0x27   : > { %1019 = vrot.lane.b32.xlu0 %v1018_v20, %s1160_s26  ;;  %379 = vrot.lane.b32.xlu1 %v1243_v21, %s1160_s26 }
  0x2b   : > { %1024 = vrot.lane.b32.xlu0 %v1023_v22, %s1164_s10  ;;  %1029 = vrot.lane.b32.xlu1 %v1018_v20, %s1165_s11 }
  0x81   : > { %v316_v23 = vpop.permute.xlu1 %315  ;;  %v328_v24 = vpop.permute.xlu0 %327 }
  0x82   : > { %v324_v25 = vmul.f32 0.0, %v316_v23  ;;  %v336_v45 = vmul.f32 0.0, %v328_v24 }
  0x84   : > { %393 = vrot.lane.b32.xlu0 %v324_v25, %s1166_s12  ;;  %v408_v54 = vrot.slane %v336_v45, 4 }
  0x85   : > { %v1253_v26 = vpop.permute.xlu1 %317  ;;  %v1255_v27 = vpop.permute.xlu0 %329 }
  0x86   : > { %v1258_v28 = vsel %vm319_vm0, %v316_v23, %v1253_v26  ;;  %v326_v29 = vmul.f32 %v1253_v26, %v1237_v18  ;;  %v1268_v34 = vsel %vm331_vm1, %v328_v24, %v1255_v27  ;;  %v338_v36 = vmul.f32 %v1255_v27, %v1237_v18 }
  0x87   : > { %v325_v30 = vmul.f32 %v1258_v28, %v1231_v17  ;;  %v337_v35 = vmul.f32 %v1268_v34, %v1231_v17 }
  0x88   : > { %v410_v52 = vrot.slane %v338_v36, 4 }
  0x89   : > { %v342_v31 = vpop.permute.xlu1 %341  ;;  %v1264_v32 = vpop.permute.xlu0 %339  ;;  %v1033_v33 = vpack.i.bf16 %v326_v29, %v325_v30  ;;  %v409_v51 = vrot.slane %v337_v35, 4 }
  0x8a   : > { %v350_v37 = vmul.f32 0.0, %v342_v31  ;;  %v1278_v40 = vsel %vm343_vm2, %v1264_v32, %v342_v31  ;;  %v348_v46 = vmul.f32 %v1264_v32, %v1231_v17 }
  0x8b   : > { %1034 = vrot.lane.b32.xlu1 %v1033_v33, %s1166_s12  ;;  %v349_v47 = vmul.f32 %v1278_v40, %v1237_v18  ;;  %v1043_v59 = vpack.i.bf16 %v410_v52, %v409_v51 }
  0x8c   : > { %v436_v53 = vrot.slane %v350_v37, 4  ;;  %v434_v55 = vrot.slane %v348_v46, 4 }
  0x8d   : > { %v354_v38 = vpop.permute.xlu1 %353  ;;  %v1275_v39 = vpop.permute.xlu0 %351  ;;  %v435_v56 = vrot.slane %v349_v47, 4 }
  0x8e   : > { %v362_v41 = vmul.f32 0.0, %v354_v38  ;;  %v1281_v42 = vsel %vm355_vm3, %v1275_v39, %v354_v38  ;;  %v360_v43 = vmul.f32 %v1275_v39, %v1231_v17 }
  0x8f   : > { %v361_v44 = vmul.f32 %v1281_v42, %v1237_v18  ;;  %v1048_v61 = vpack.i.bf16 %v435_v56, %v434_v55 }
  0x90   : > { %456 = vrot.lane.b32.xlu0 %v362_v41, %s1167_s13 }
  0x91   : > { %v1038_v48 = vpack.i.bf16 %v361_v44, %v360_v43  ;;  %v366_v49 = vpop.permute.xlu1 %365  ;;  %v1292_v50 = vpop.permute.xlu0 %363 }
  0x92   : > { %v1306_v62 = vsel %vm367_vm5, %v1292_v50, %v366_v49  ;;  %v372_v4 = vmul.f32 %v1292_v50, %v1231_v17  ;;  %v374_v9 = vmul.f32 0.0, %v366_v49 }
  0x93   : > { %1039 = vrot.lane.b32.xlu1 %v1038_v48, %s1167_s13  ;;  %v373_v5 = vmul.f32 %v1306_v62, %v1237_v18 }
  0x94   : > { %441 = vrot.lane.b32.xlu0 %v436_v53, %s1168_s14 }
  0x95   : > { %v284_v57 = vpop.permute.xlu0 %283  ;;  %v1296_v58 = vpop.permute.xlu1 %285 }
  0x96   : > { %v1300_v60 = vsel %vm287_vm4, %v284_v57, %v1296_v58  ;;  %v294_v1 = vmul.f32 %v1296_v58, %v1237_v18  ;;  %v1332_v19 = vmul.f32 0.0, %v284_v57 }
  0x97   : > { %411 = vrot.lane.b32.xlu1 %v408_v54, %s1169_s15  ;;  %v293_v0 = vmul.f32 %v1300_v60, %v1231_v17 }
  0x98   : > { %1044 = vrot.lane.b32.xlu0 %v1043_v59, %s1169_s15 }
  0x99   : > { %v1020_v63 = vpop.permute.xlu0 %1019  ;;  %v1326_v11 = vpop.permute.xlu1 %379 }
  0x9a   : > { %v1022_v2 = vunpack.i.h.bf16 %v1020_v63  ;;  %v1021_v3 = vunpack.i.l.bf16 %v1020_v63 }
  0x9b   : > { %1049 = vrot.lane.b32.xlu1 %v1048_v61, %s1168_s14 }
  0x9c   : > { %468 = vrot.lane.b32.xlu0 %v1243_v21, %s1165_s11  ;;  %v386_v6 = vsel %vm331_vm1, %v1021_v3, %v1022_v2  ;;  %v491_v8 = vsel %vm488_vm6, %v294_v1, %v1022_v2  ;;  %v385_v21 = vsel %vm331_vm1, %v1326_v11, %v1021_v3 }
  0x9d   : > { %v490_v7 = vsel %vm488_vm6, %v293_v0, %v386_v6  ;;  %v1025_v12 = vpop.permute.xlu0 %1024  ;;  %v1030_v13 = vpop.permute.xlu1 %1029  ;;  %v489_v30 = vsel %vm488_vm6, %v1332_v19, %v385_v21 }
  0x9e   : > { %v1053_v10 = vpack.i.bf16 %v491_v8, %v490_v7  ;;  %v1027_v33 = vunpack.i.h.bf16 %v1025_v12  ;;  %v1026_v35 = vunpack.i.l.bf16 %v1025_v12  ;;  %v1032_v38 = vunpack.i.h.bf16 %v1030_v13 }
  0x9f   : > { %479 = vrot.lane.b32.xlu1 %v372_v4, %s1170_s16  ;;  %v1031_v41 = vunpack.i.l.bf16 %v1030_v13 }
  0xa0   : > { %481 = vrot.lane.b32.xlu0 %v373_v5, %s1170_s16  ;;  %v427_v63 = vsel %vm287_vm4, %v1026_v35, %v1027_v33 }
  0xa1   : > { %v471_v5 = vsel %vm470_vm8, %v1031_v41, %v1032_v38 }
  0xa3   : > { %483 = vrot.lane.b32.xlu1 %v374_v9, %s1170_s16 }
  0xa4   : > { %1054 = vrot.lane.b32.xlu0 %v1053_v10, %s1163_s9 }
  0xf6   : > { %v1328_v14 = vpop.permute.xlu0 %393 }
  0xfd   : > { %v1035_v15 = vpop.permute.xlu1 %1034 }
  0xfe   : > { %v1037_v22 = vunpack.i.h.bf16 %v1035_v15  ;;  %v1036_v23 = vunpack.i.l.bf16 %v1035_v15 }
 0x100   : > { %v400_v43 = vsel %vm399_vm7, %v1328_v14, %v1036_v23  ;;  %v401_v44 = vsel %vm399_vm7, %v1036_v23, %v1037_v22 }
 0x102   : > { %v1330_v17 = vpop.permute.xlu0 %456 }
 0x105   : > { %v1040_v18 = vpop.permute.xlu1 %1039 }
 0x106   : > { %v1334_v20 = vpop.permute.xlu0 %441  ;;  %v1042_v24 = vunpack.i.h.bf16 %v1040_v18  ;;  %v1041_v25 = vunpack.i.l.bf16 %v1040_v18 }
 0x108   : > { %v459_v45 = vsel %vm458_vm9, %v1041_v25, %v1042_v24  ;;  %v460_v56 = vsel %vm458_vm9, %v1042_v24, %v1330_v17  ;;  %v498_v13 = vsel %vm488_vm6, %v1041_v25, %v1031_v41  ;;  %v255_v24 = vld [vmem:[%s1496_s2] sm:$0xf] }
 0x109   : > { %v1338_v29 = vpop.permute.xlu1 %411  ;;  %v499_v8 = vsel %vm488_vm6, %v459_v45, %v471_v5 }
 0x10a   : > { %v1045_v31 = vpop.permute.xlu0 %1044 }
 0x10b   : > { %v1047_v36 = vunpack.i.h.bf16 %v1045_v31  ;;  %v1046_v37 = vunpack.i.l.bf16 %v1045_v31 }
 0x10d   : > { %v418_v46 = vsel %vm417_vm10, %v1338_v29, %v1046_v37  ;;  %v419_v47 = vsel %vm417_vm10, %v1046_v37, %v1047_v36  ;;  %v1050_v48 = vpop.permute.xlu1 %1049  ;;  %v494_v49 = vsel %vm488_vm6, %v1037_v22, %v1047_v36  ;;  %v1171_v22 = vmov 0  }
 0x10e   : > { %v1052_v51 = vunpack.i.h.bf16 %v1050_v48  ;;  %v1051_v52 = vunpack.i.l.bf16 %v1050_v48  ;;  %v1350_v53 = vpop.permute.xlu0 %468  ;;  %v493_v54 = vsel %vm488_vm6, %v401_v44, %v419_v47  ;;  %v492_v55 = vsel %vm488_vm6, %v400_v43, %v418_v46  ;;  %1083 = vset.pattern.permute.xlu1 %v1171_v22  ;;  %1149 = vset.pattern.permute.xlu0 %v1171_v22 }
 0x10f   : > { %v472_v57 = vsel %vm470_vm8, %v1032_v38, %v1350_v53  ;;  %v1058_v59 = vpack.i.bf16 %v494_v49, %v493_v54  ;;  %v1063_v61 = vpack.i.bf16 %v492_v55, %v489_v30 }
 0x110   : > { %v445_v0 = vsel %vm443_vm11, %v1052_v51, %v1334_v20  ;;  %v444_v1 = vsel %vm443_vm11, %v1051_v52, %v1052_v51  ;;  %v500_v2 = vsel %vm488_vm6, %v460_v56, %v472_v57  ;;  %v495_v12 = vsel %vm488_vm6, %v1026_v35, %v1051_v52 }
 0x111   : > { %1059 = vrot.lane.b32.xlu1 %v1058_v59, %s1163_s9  ;;  %1064 = vrot.lane.b32.xlu0 %v1063_v61, %s1163_s9  ;;  %v496_v3 = vsel %vm488_vm6, %v427_v63, %v444_v1  ;;  %v497_v4 = vsel %vm488_vm6, %v1027_v33, %v445_v0  ;;  %v480_v6 = vpop.permute.xlu1 %479  ;;  %v1068_v9 = vpack.i.bf16 %v500_v2, %v499_v8 }
 0x112   : > { %v1073_v7 = vpack.i.bf16 %v497_v4, %v496_v3  ;;  %v482_v10 = vpop.permute.xlu0 %481  ;;  %v1078_v18 = vpack.i.bf16 %v498_v13, %v495_v12 }
 0x113   : > { %v486_v15 = vsel %vm485_vm12, %v480_v6, %v482_v10 }
 0x115   : > { %1074 = vrot.lane.b32.xlu1 %v1073_v7, %s1163_s9  ;;  %1069 = vrot.lane.b32.xlu0 %v1068_v9, %s1163_s9  ;;  %v1374_v21 = vpop.permute.xlu1 %483  ;;  %v254_v9 = vld [vmem:[%s1495_s1] sm:$0xf] }
 0x116   : > { %v487_v23 = vsel %vm485_vm12, %v482_v10, %v1374_v21  ;;  %v1055_v25 = vpop.permute.xlu0 %1054 }
 0x117   : > { %v1057_v30 = vunpack.i.h.bf16 %v1055_v25  ;;  %v1056_v31 = vunpack.i.l.bf16 %v1055_v25 }
 0x119   : > { %1079 = vrot.lane.b32.xlu1 %v1078_v18, %s1163_s9  ;;  %544 = vrot.lane.b32.xlu0 %v486_v15, %s1163_s9  ;;  %v549_v43 = vsel %vm367_vm5, %v1056_v31, %v1057_v30 }
 0x11d   : > { %546 = vrot.lane.b32.xlu1 %v487_v23, %s1163_s9  ;;  %542 = vrot.lane.b32.xlu0 %v480_v6, %s1163_s9 }
 0x121   : > { %503 = vperm.xlu1 %1083, %v255_v24  }
 0x183   : > { %v1060_v33 = vpop.permute.xlu1 %1059  ;;  %v1065_v35 = vpop.permute.xlu0 %1064 }
 0x184   : > { %v1062_v36 = vunpack.i.h.bf16 %v1060_v33  ;;  %v1061_v37 = vunpack.i.l.bf16 %v1060_v33  ;;  %v1067_v38 = vunpack.i.h.bf16 %v1065_v35  ;;  %v1066_v41 = vunpack.i.l.bf16 %v1065_v35 }
 0x186   : > { %v551_v44 = vsel %vm367_vm5, %v1061_v37, %v1062_v36  ;;  %v548_v45 = vsel %vm367_vm5, %v1066_v41, %v1056_v31  ;;  %v550_v46 = vsel %vm367_vm5, %v1067_v38, %v1061_v37 }
 0x187   : > { %v1075_v47 = vpop.permute.xlu1 %1074  ;;  %v1070_v48 = vpop.permute.xlu0 %1069  ;;  %v980_v49 = vpack.c.bf16 %v551_v44, %v549_v43  ;;  %v982_v51 = vpack.c.bf16 %v550_v46, %v548_v45 }
 0x188   : > { %v1077_v52 = vunpack.i.h.bf16 %v1075_v47  ;;  %v1076_v54 = vunpack.i.l.bf16 %v1075_v47  ;;  %v1072_v55 = vunpack.i.h.bf16 %v1070_v48  ;;  %v1071_v56 = vunpack.i.l.bf16 %v1070_v48 }
 0x189   : > { %981 = vmatprep.subr.bf16.mxu0 %v980_v49 }
 0x18a   : > { %983 = vmatpush1.bf16.msra.mxu0 %v982_v51  ;;  %v553_v57 = vsel %vm367_vm5, %v1076_v54, %v1077_v52  ;;  %v555_v59 = vsel %vm367_vm5, %v1071_v56, %v1072_v55 }
 0x18b   : > { %v1080_v61 = vpop.permute.xlu1 %1079  ;;  %v545_v63 = vpop.permute.xlu0 %544  ;;  %v984_v0 = vpack.c.bf16 %v555_v59, %v553_v57 }
 0x18c   : > { %v1082_v1 = vunpack.i.h.bf16 %v1080_v61  ;;  %v1081_v2 = vunpack.i.l.bf16 %v1080_v61 }
 0x18d   : > { %985 = vmatprep.subr.bf16.mxu0 %v984_v0 }
 0x18e   : > { %v552_v3 = vsel %vm367_vm5, %v1081_v2, %v1076_v54  ;;  %v554_v4 = vsel %vm367_vm5, %v1082_v1, %v1071_v56 }
 0x18f   : > { %v547_v5 = vpop.permute.xlu1 %546  ;;  %v986_v6 = vpack.c.bf16 %v554_v4, %v552_v3  ;;  %v543_v8 = vpop.permute.xlu0 %542 }
 0x190   : > { %v557_v7 = vsel %vm367_vm5, %v545_v63, %v547_v5  ;;  %v556_v10 = vsel %vm367_vm5, %v543_v8, %v545_v63 }
 0x191   : > { %987 = vmatpush1.bf16.msra.mxu0 %v986_v6 }
 0x192   : > { %970 = vmatprep.subr.msk.mxu0 %vm488_vm6, %v557_v7 }
 0x195   : > { %971 = vmatpush1.msk.msra.mxu0 %vm488_vm6, %v556_v10 }
 0x196   : > { %972 = vmatmul.mubr.msk.f32.vlgmr.msra.gmra.mrb[0].mxu0 %vm566_vm13, %v254_v9 }
 0x1a0   : > { %v504_v12 = vpop.permute.xlu1 %503 }
 0x269   : > { %v640_v13 = vpop.f32.mrb[0].mxu0 }
 0x26a   : > { %v641_v15 = vadd.f32 %v640_v13, %v504_v12  ;;  %v642_v18 = vpop.f32.mrb[1].mxu0 }
 0x26b   : > { %v643_v22 = vadd.f32 %v642_v18, %v504_v12 }
 0x26c   : > { %v645_v23 = vmax.f32 %v641_v15, 0.0 }
 0x26d   : > { %v646_v24 = vmax.f32 %v643_v22, 0.0 }
 0x26e   : > { %v661_v25 = vrot.slane %v645_v23, 4  ;;  %v649_v30 = vmul.f32 %v645_v23, %v1258_v28  ;;  %v651_v31 = vmul.f32 %v645_v23, %v1268_v34  ;;  %v655_v33 = vmul.f32 %v645_v23, %v1275_v39 }
 0x26f   : > { %v1084_v35 = vpack.i.bf16 %v646_v24, %v645_v23  ;;  %v662_v36 = vrot.slane %v646_v24, 4  ;;  %v650_v37 = vmul.f32 %v646_v24, %v1253_v26  ;;  %v652_v38 = vmul.f32 %v646_v24, %v1255_v27 }
 0x270   : > { %v685_v41 = vrot.slane %v651_v31, 4  ;;  %v656_v43 = vmul.f32 %v646_v24, %v1281_v42  ;;  %v653_v44 = vmul.f32 %v645_v23, %v1264_v32  ;;  %v654_v45 = vmul.f32 %v646_v24, %v1278_v40 }
 0x271   : > { %1085 = vrot.lane.b32.xlu1 %v1084_v35, %s1164_s10  ;;  %v1089_v28 = vpack.i.bf16 %v662_v36, %v661_v25  ;;  %v1094_v46 = vpack.i.bf16 %v650_v37, %v649_v30  ;;  %v686_v34 = vrot.slane %v652_v38, 4  ;;  %v657_v27 = vmul.f32 %v645_v23, %v1292_v50 }
 0x272   : > { %v1099_v47 = vpack.i.bf16 %v656_v43, %v655_v33  ;;  %v706_v39 = vrot.slane %v653_v44, 4  ;;  %v707_v48 = vrot.slane %v654_v45, 4  ;;  %v658_v32 = vmul.f32 %v646_v24, %v1306_v62 }
 0x273   : > { %1090 = vrot.lane.b32.xlu0 %v1089_v28, %s1160_s26  ;;  %v1104_v26 = vpack.i.bf16 %v686_v34, %v685_v41  ;;  %v647_v55 = vmul.f32 %v645_v23, %v1300_v60  ;;  %v648_v56 = vmul.f32 %v646_v24, %v1296_v58 }
 0x274   : > { %v1109_v49 = vpack.i.bf16 %v707_v48, %v706_v39 }
 0x275   : > { %1095 = vrot.lane.b32.xlu1 %v1094_v46, %s1166_s12 }
 0x277   : > { %1105 = vrot.lane.b32.xlu0 %v1104_v26, %s1169_s15  ;;  %v257_v26 = vld [vmem:[%s1498_s4] sm:$0xf] }
 0x279   : > { %1100 = vrot.lane.b32.xlu1 %v1099_v47, %s1167_s13 }
 0x27b   : > { %1110 = vrot.lane.b32.xlu0 %v1109_v49, %s1168_s14 }
 0x27d   : > { %739 = vrot.lane.b32.xlu1 %v657_v27, %s1170_s16 }
 0x27f   : > { %1115 = vrot.lane.b32.xlu0 %v1089_v28, %s1165_s11 }
 0x283   : > { %741 = vrot.lane.b32.xlu0 %v658_v32, %s1170_s16 }
 0x2e3   : > { %v1086_v40 = vpop.permute.xlu1 %1085 }
 0x2e4   : > { %v1088_v2 = vunpack.i.h.bf16 %v1086_v40  ;;  %v1087_v3 = vunpack.i.l.bf16 %v1086_v40 }
 0x2e5   : > { %v1091_v42 = vpop.permute.xlu0 %1090 }
 0x2e6   : > { %v1093_v51 = vunpack.i.h.bf16 %v1091_v42  ;;  %v1092_v52 = vunpack.i.l.bf16 %v1091_v42  ;;  %v700_v24 = vsel %vm287_vm4, %v1087_v3, %v1088_v2 }
 0x2e7   : > { %v1096_v54 = vpop.permute.xlu1 %1095 }
 0x2e8   : > { %v668_v57 = vsel %vm331_vm1, %v1092_v52, %v1093_v51  ;;  %v1098_v50 = vunpack.i.h.bf16 %v1096_v54  ;;  %v1097_v59 = vunpack.i.l.bf16 %v1096_v54  ;;  %v747_v62 = vsel %vm488_vm6, %v648_v56, %v1093_v51 }
 0x2e9   : > { %v1106_v61 = vpop.permute.xlu0 %1105  ;;  %v746_v63 = vsel %vm488_vm6, %v647_v55, %v668_v57  ;;  %v667_v4 = vsel %vm331_vm1, %v1326_v11, %v1092_v52 }
 0x2ea   : > { %v1108_v0 = vunpack.i.h.bf16 %v1106_v61  ;;  %v1107_v1 = vunpack.i.l.bf16 %v1106_v61  ;;  %v1119_v5 = vpack.i.bf16 %v747_v62, %v746_v63  ;;  %v678_v58 = vsel %vm399_vm7, %v1328_v14, %v1097_v59 }
 0x2eb   : > { %v679_v60 = vsel %vm399_vm7, %v1097_v59, %v1098_v50  ;;  %v1101_v8 = vpop.permute.xlu1 %1100  ;;  %v745_v14 = vsel %vm488_vm6, %v1332_v19, %v667_v4 }
 0x2ec   : > { %v691_v6 = vsel %vm417_vm10, %v1338_v29, %v1107_v1  ;;  %v692_v7 = vsel %vm417_vm10, %v1107_v1, %v1108_v0  ;;  %1120 = vrot.lane.b32.xlu1 %v1119_v5, %s1163_s9  ;;  %v750_v12 = vsel %vm488_vm6, %v1098_v50, %v1108_v0  ;;  %v1103_v18 = vunpack.i.h.bf16 %v1101_v8 }
 0x2ed   : > { %v1111_v9 = vpop.permute.xlu0 %1110  ;;  %v749_v10 = vsel %vm488_vm6, %v679_v60, %v692_v7  ;;  %v748_v11 = vsel %vm488_vm6, %v678_v58, %v691_v6  ;;  %v1102_v22 = vunpack.i.l.bf16 %v1101_v8 }
 0x2ee   : > { %v1113_v13 = vunpack.i.h.bf16 %v1111_v9  ;;  %v1112_v15 = vunpack.i.l.bf16 %v1111_v9  ;;  %v1134_v29 = vpack.i.bf16 %v750_v12, %v749_v10  ;;  %v1124_v23 = vpack.i.bf16 %v748_v11, %v745_v14 }
 0x2ef   : > { %v724_v38 = vsel %vm458_vm9, %v1103_v18, %v1330_v17  ;;  %v723_v41 = vsel %vm458_vm9, %v1102_v22, %v1103_v18  ;;  %v256_v18 = vld [vmem:[%s1497_s3] sm:$0xf] }
 0x2f0   : > { %v713_v25 = vsel %vm443_vm11, %v1113_v13, %v1334_v20  ;;  %v712_v30 = vsel %vm443_vm11, %v1112_v15, %v1113_v13  ;;  %1135 = vrot.lane.b32.xlu0 %v1134_v29, %s1163_s9  ;;  %1125 = vrot.lane.b32.xlu1 %v1124_v23, %s1163_s9  ;;  %v751_v44 = vsel %vm488_vm6, %v1087_v3, %v1112_v15 }
 0x2f1   : > { %v1116_v31 = vpop.permute.xlu0 %1115  ;;  %v752_v33 = vsel %vm488_vm6, %v700_v24, %v712_v30  ;;  %v753_v19 = vsel %vm488_vm6, %v1088_v2, %v713_v25 }
 0x2f2   : > { %v1118_v35 = vunpack.i.h.bf16 %v1116_v31  ;;  %v1117_v36 = vunpack.i.l.bf16 %v1116_v31  ;;  %v1139_v37 = vpack.i.bf16 %v753_v19, %v752_v33 }
 0x2f4   : > { %v733_v20 = vsel %vm470_vm8, %v1118_v35, %v1350_v53  ;;  %v732_v43 = vsel %vm470_vm8, %v1117_v36, %v1118_v35  ;;  %v754_v45 = vsel %vm488_vm6, %v1102_v22, %v1117_v36  ;;  %1140 = vrot.lane.b32.xlu0 %v1139_v37, %s1163_s9  ;;  %v740_v53 = vpop.permute.xlu1 %739 }
 0x2f5   : > { %v1144_v28 = vpack.i.bf16 %v754_v45, %v751_v44  ;;  %v755_v46 = vsel %vm488_vm6, %v723_v41, %v732_v43  ;;  %v756_v34 = vsel %vm488_vm6, %v724_v38, %v733_v20  ;;  %v742_v17 = vpop.permute.xlu0 %741 }
 0x2f6   : > { %v1129_v47 = vpack.i.bf16 %v756_v34, %v755_v46  ;;  %v743_v39 = vsel %vm485_vm12, %v740_v53, %v742_v17  ;;  %v744_v48 = vsel %vm485_vm12, %v742_v17, %v1374_v21 }
 0x2f8   : > { %1130 = vrot.lane.b32.xlu1 %v1129_v47, %s1163_s9  ;;  %1145 = vrot.lane.b32.xlu0 %v1144_v28, %s1163_s9 }
 0x2fc   : > { %800 = vrot.lane.b32.xlu1 %v743_v39, %s1163_s9  ;;  %802 = vrot.lane.b32.xlu0 %v744_v48, %s1163_s9 }
 0x300   : > { %798 = vrot.lane.b32.xlu1 %v740_v53, %s1163_s9  ;;  %759 = vperm.xlu0 %1149, %v257_v26  }
 0x35e   : > { %v1121_v49 = vpop.permute.xlu1 %1120 }
 0x35f   : > { %v1123_v27 = vunpack.i.h.bf16 %v1121_v49  ;;  %v1122_v32 = vunpack.i.l.bf16 %v1121_v49 }
 0x361   : > { %v805_v55 = vsel %vm367_vm5, %v1122_v32, %v1123_v27 }
 0x362   : > { %v1136_v40 = vpop.permute.xlu0 %1135  ;;  %v1126_v42 = vpop.permute.xlu1 %1125 }
 0x363   : > { %v1138_v51 = vunpack.i.h.bf16 %v1136_v40  ;;  %v1137_v52 = vunpack.i.l.bf16 %v1136_v40  ;;  %v1128_v54 = vunpack.i.h.bf16 %v1126_v42  ;;  %v1127_v21 = vunpack.i.l.bf16 %v1126_v42 }
 0x365   : > { %v807_v56 = vsel %vm367_vm5, %v1137_v52, %v1138_v51  ;;  %v804_v57 = vsel %vm367_vm5, %v1127_v21, %v1122_v32  ;;  %v806_v50 = vsel %vm367_vm5, %v1128_v54, %v1137_v52 }
 0x366   : > { %v1141_v59 = vpop.permute.xlu0 %1140  ;;  %v988_v61 = vpack.c.bf16 %v807_v56, %v805_v55  ;;  %v990_v63 = vpack.c.bf16 %v806_v50, %v804_v57 }
 0x367   : > { %v1143_v62 = vunpack.i.h.bf16 %v1141_v59  ;;  %v1142_v0 = vunpack.i.l.bf16 %v1141_v59 }
 0x368   : > { %989 = vmatprep.subr.bf16.mxu1 %v988_v61 }
 0x369   : > { %991 = vmatpush1.bf16.msra.mxu1 %v990_v63  ;;  %v809_v60 = vsel %vm367_vm5, %v1142_v0, %v1143_v62 }
 0x36a   : > { %v1131_v1 = vpop.permute.xlu1 %1130  ;;  %v1146_v2 = vpop.permute.xlu0 %1145 }
 0x36b   : > { %v1133_v3 = vunpack.i.h.bf16 %v1131_v1  ;;  %v1132_v4 = vunpack.i.l.bf16 %v1131_v1  ;;  %v1148_v5 = vunpack.i.h.bf16 %v1146_v2  ;;  %v1147_v58 = vunpack.i.l.bf16 %v1146_v2 }
 0x36d   : > { %v811_v6 = vsel %vm367_vm5, %v1132_v4, %v1133_v3  ;;  %v808_v9 = vsel %vm367_vm5, %v1147_v58, %v1142_v0  ;;  %v810_v10 = vsel %vm367_vm5, %v1148_v5, %v1132_v4 }
 0x36e   : > { %v801_v7 = vpop.permute.xlu1 %800  ;;  %v992_v8 = vpack.c.bf16 %v811_v6, %v809_v60  ;;  %v803_v12 = vpop.permute.xlu0 %802  ;;  %v994_v11 = vpack.c.bf16 %v810_v10, %v808_v9 }
 0x36f   : > { %v813_v13 = vsel %vm367_vm5, %v801_v7, %v803_v12 }
 0x370   : > { %993 = vmatprep.subr.bf16.mxu1 %v992_v8 }
 0x371   : > { %995 = vmatpush1.bf16.msra.mxu1 %v994_v11 }
 0x372   : > { %v799_v15 = vpop.permute.xlu1 %798  ;;  %973 = vmatprep.subr.msk.mxu1 %vm488_vm6, %v813_v13 }
 0x373   : > { %v812_v14 = vsel %vm367_vm5, %v799_v15, %v801_v7 }
 0x375   : > { %974 = vmatpush1.msk.msra.mxu1 %vm488_vm6, %v812_v14 }
 0x376   : > { %975 = vmatmul.mubr.msk.f32.vlgmr.msra.gmra.mrb[0].mxu1 %vm566_vm13, %v256_v18 }
 0x37f   : > { %v760_v22 = vpop.permute.xlu0 %759 }
 0x449   : > { %v895_v29 = vpop.f32.mrb[0].mxu1 }
 0x44a   : > { %v896_v23 = vadd.f32 %v895_v29, %v760_v22  ;;  %v897_v24 = vpop.f32.mrb[1].mxu1 }
 0x44b   : > { %v898_v25 = vadd.f32 %v897_v24, %v760_v22 }
 0x44d   : > { %v902_v30 = vcombine.low %v896_v23, %v898_v25 }
 0x44f   : > { %v904_v31 = vadd.f32 %v902_v30, %v1228_v16 }
 0x451   : > { %905 = vst [vmem:[%s251_s30] sm:$0xff] %v904_v31 }
 0x452 PF: > { %s16_s21 = sadd.s32 1, %s1156_s21  }
 0x453   : > { %p13_p4 = scmp.ge.s32.totalorder %s16_s21, 4  }
 0x455   :  { %15 = sbr.rel (!%p13_p4) target bundleno = 1 (0x1), region = 74 }

</bundles_post_ra>
